<compile_context>
chip_gen: v6e
topology: v6e:2x2x1
jax: 0.10.0
libtpu: 0.0.40
codegen_flags: <defaults>
</compile_context>

<pallas_src>
import functools

import jax
import jax.numpy as jnp
from jax.experimental import pallas as pl
from jax.experimental.pallas import tpu as pltpu

_SUBLANE = 8
_LANE = 128


def _bernoulli_linear_sigmoid_kernel(x_ref, wt_ref, b_ref, o_ref):
    # Hot path: MXU matmul (f32 accumulation) + f32 bias/sigmoid epilogue (VPU/EUP).
    x = x_ref[...]            # (tb, Din)
    wt = wt_ref[...]          # (Din, Dout_p)  -- already transposed, VMEM-resident
    b = b_ref[...]            # (1, Dout_p)    -- f32, VMEM-resident
    logits = jnp.dot(x, wt, preferred_element_type=jnp.float32) + b
    o_ref[...] = jax.nn.sigmoid(logits).astype(o_ref.dtype)


def _round_up(n, m):
    return ((n + m - 1) // m) * m


@functools.partial(jax.jit, static_argnames=("block_b", "use_bf16"))
def bernoulli_layer_forward(x, weight, bias, *, block_b=512, use_bf16=False):
    """Pallas implementation of BernoulliLayer1D.forward. Returns (mu,).

    x:      (B, Din)
    weight: (Dout, Din)   -- torch.nn.Linear layout
    bias:   (Dout,)
    """
    B, Din = x.shape
    Dout, Din_w = weight.shape
    assert Din == Din_w

    # --- one-time layout / dtype work (outside the hot kernel) -----------------
    w_t = weight.T                                   # (Din, Dout): removes in-kernel .T
    if use_bf16:
        # bf16 MXU operands, f32 accumulation + f32 epilogue (v6e/v7x lever).
        x_c = x.astype(jnp.bfloat16)
        w_t = w_t.astype(jnp.bfloat16)
    else:
        x_c = x

    # Lane-dense output: pad Dout to a multiple of 128 so stores are unmasked vst.
    Dout_p = _round_up(Dout, _LANE)
    if Dout_p != Dout:
        w_t = jnp.pad(w_t, ((0, 0), (0, Dout_p - Dout)))
        bias_p = jnp.pad(bias, (0, Dout_p - Dout))
    else:
        bias_p = bias
    bias2d = bias_p.reshape(1, Dout_p).astype(jnp.float32)

    # Batch tiling: sublane-aligned tiles, large enough to pipeline.
    tb = min(block_b, _round_up(B, _SUBLANE))
    tb = _round_up(tb, _SUBLANE)
    B_p = _round_up(B, tb)
    if B_p != B:
        x_c = jnp.pad(x_c, ((0, B_p - B), (0, 0)))
    grid = (B_p // tb,)

    out = pl.pallas_call(
        _bernoulli_linear_sigmoid_kernel,
        out_shape=jax.ShapeDtypeStruct((B_p, Dout_p), x.dtype),
        grid=grid,
        in_specs=[
            pl.BlockSpec((tb, Din), lambda i: (i, 0)),       # x streams over batch
            pl.BlockSpec((Din, Dout_p), lambda i: (0, 0)),   # weight resident in VMEM
            pl.BlockSpec((1, Dout_p), lambda i: (0, 0)),     # bias resident in VMEM
        ],
        out_specs=pl.BlockSpec((tb, Dout_p), lambda i: (i, 0)),
        compiler_params=pltpu.CompilerParams(
            dimension_semantics=("parallel",),               # shards batch across TCs (v7x)
        ),
    )(x_c, w_t, bias2d)

    mu = out[:B, :Dout]                                      # drop batch / lane padding
    return (mu,)


if __name__ == "__main__":
    # Module config: pinput = {'dim': 32}, poutput = {'dim': 16}
    batch = 8
    input_dim = 32
    output_dim = 16

    key = jax.random.PRNGKey(0)
    kx, kw, kb = jax.random.split(key, 3)

    # Deterministic parameter init (xavier-ish scaling, as init_module(..., 'Sigmoid') would)
    x = jax.random.normal(kx, (batch, input_dim), dtype=jnp.float32)
    scale = jnp.sqrt(2.0 / (input_dim + output_dim))
    weight = jax.random.normal(kw, (output_dim, input_dim), dtype=jnp.float32) * scale
    bias = jax.random.normal(kb, (output_dim,), dtype=jnp.float32) * 0.01

    (mu,) = bernoulli_layer_forward(x, weight, bias)
    mu = jax.block_until_ready(mu)

    # Reference check in plain JAX
    ref = jax.nn.sigmoid(x @ weight.T + bias)
    assert mu.shape == (batch, output_dim)
    assert jnp.allclose(mu, ref, atol=1e-5, rtol=1e-5)

    print("KERNEL_OK")
</pallas_src>

<mosaic_0001>
module attributes {stable_mosaic.version = 11 : i64} {
  func.func @_bernoulli_linear_sigmoid_kernel(%arg0: i32, %arg1: memref<8x32xf32, #tpu.memory_space<vmem>>, %arg2: memref<32x128xf32, #tpu.memory_space<vmem>>, %arg3: memref<1x128xf32, #tpu.memory_space<vmem>>, %arg4: memref<8x128xf32, #tpu.memory_space<vmem>>) attributes {dimension_semantics = [#tpu.dimension_semantics<parallel>], iteration_bounds = array<i64: 1>, scalar_prefetch = 0 : i64, scratch_operands = 0 : i64, tpu.core_type = #tpu.core_type<tc>, window_params = [{transform_indices = @transform_0, window_bounds = array<i64: 8, 32>}, {pipeline_mode = #tpu.pipeline_mode<synchronous>, transform_indices = @transform_1, window_bounds = array<i64: 32, 128>}, {pipeline_mode = #tpu.pipeline_mode<synchronous>, transform_indices = @transform_2, window_bounds = array<i64: 1, 128>}, {transform_indices = @transform_3, window_bounds = array<i64: 8, 128>}]} {
    %c0 = arith.constant 0 : index
    %c0_0 = arith.constant 0 : index
    %0 = vector.load %arg1[%c0, %c0_0] : memref<8x32xf32, #tpu.memory_space<vmem>>, vector<8x32xf32>
    %c0_1 = arith.constant 0 : index
    %c0_2 = arith.constant 0 : index
    %1 = vector.load %arg2[%c0_1, %c0_2] : memref<32x128xf32, #tpu.memory_space<vmem>>, vector<32x128xf32>
    %c0_3 = arith.constant 0 : index
    %c0_4 = arith.constant 0 : index
    %2 = vector.load %arg3[%c0_3, %c0_4] : memref<1x128xf32, #tpu.memory_space<vmem>>, vector<1x128xf32>
    %cst = arith.constant dense<0.000000e+00> : vector<8x128xf32>
    %3 = tpu.matmul %0, %1, %cst {dimension_numbers = #tpu.dot_dimension_numbers<[1], [0], [0], [1], [0, 0, 1, 1], [], []>} : vector<8x32xf32>, vector<32x128xf32>, vector<8x128xf32> -> vector<8x128xf32>
    %4 = vector.broadcast %2 : vector<1x128xf32> to vector<8x128xf32>
    %5 = arith.addf %3, %4 : vector<8x128xf32>
    %6 = arith.negf %5 : vector<8x128xf32>
    %7 = math.exp %6 : vector<8x128xf32>
    %cst_5 = arith.constant 1.000000e+00 : f32
    %8 = vector.broadcast %cst_5 : f32 to vector<8x128xf32>
    %9 = arith.addf %8, %7 : vector<8x128xf32>
    %10 = arith.divf %8, %9 : vector<8x128xf32>
    %c0_6 = arith.constant 0 : index
    %c0_7 = arith.constant 0 : index
    %11 = vector.load %arg4[%c0_6, %c0_7] : memref<8x128xf32, #tpu.memory_space<vmem>>, vector<8x128xf32>
    tpu.vector_store %arg4[%c0_6, %c0_7], %10 {strides = array<i32>} : memref<8x128xf32, #tpu.memory_space<vmem>>, vector<8x128xf32>,
    return
  }
  func.func @transform_0(%arg0: i32) -> (i32, i32) {
    %c0_i32 = arith.constant 0 : i32
    %c0_i32_0 = arith.constant 0 : i32
    return %arg0, %c0_i32 : i32, i32
  }
  func.func @transform_1(%arg0: i32) -> (i32, i32) {
    %c0_i32 = arith.constant 0 : i32
    %c0_i32_0 = arith.constant 0 : i32
    %c0_i32_1 = arith.constant 0 : i32
    return %c0_i32, %c0_i32_0 : i32, i32
  }
  func.func @transform_2(%arg0: i32) -> (i32, i32) {
    %c0_i32 = arith.constant 0 : i32
    %c0_i32_0 = arith.constant 0 : i32
    %c0_i32_1 = arith.constant 0 : i32
    return %c0_i32, %c0_i32_0 : i32, i32
  }
  func.func @transform_3(%arg0: i32) -> (i32, i32) {
    %c0_i32 = arith.constant 0 : i32
    %c0_i32_0 = arith.constant 0 : i32
    return %arg0, %c0_i32 : i32, i32
  }
}

</mosaic_0001>

<bundles_post_ra>
// kernel: bernoulli_layer_forward.1
= control target key start
LH: loop header
LB: loop body
LE: loop exit
PB: predicated region body
PF: predicated region fallthrough
CT: control target
= control target key end

     0   :  { %v170_v1 = vmov 0.0   ;;  %vm171_vm0 = vmmov 0   ;;  %s214_s0 = inlined_call_operand.vmem [shape: f32[8,32], index: 0, kind: input, shape index: {}]   ;;  %s215_s1 = inlined_call_operand.vmem [shape: f32[32,128], index: 1, kind: input, shape index: {}]   ;;  %s216_s2 = inlined_call_operand.vmem [shape: f32[1,128], index: 2, kind: input, shape index: {}]   ;;  %s217_s3 = inlined_call_operand.hbm [shape: f32[8,128], index: 3, kind: output, shape index: {}]  }
   0x1   :  { %v19_v0 = vld [vmem:[%s215_s1 + $0x18] sm:$0xff]  ;;  %130 = vmatprep.subr.mxu0 %v170_v1  ;;  %v18_v2 = vld [vmem:[%s215_s1 + $0x10] sm:$0xff]  ;;  %138 = vmatprep.mubr.msk.f32.mxu0 %vm171_vm0, %v170_v1 }
   0x2   :  { %131 = vmatpush3.msra.mxu0 %v19_v0 }
   0x3   :  { %8 = vsyncpa [#allocation3], 0  ;;  %132 = vmatprep.subr.mxu0 %v170_v1  ;;  %v17_v3 = vld [vmem:[%s215_s1 + $0x8] sm:$0xff]  ;;  %v16_v4 = vld [vmem:[%s215_s1] sm:$0xff]  ;;  %vm27_vm1 = vcmask 261120   ;;  %s172_s1 = smov [#allocation2]  }
   0x4   :  { %133 = vmatpush3.msra.mxu0 %v18_v2  ;;  %v15_v5 = vld [vmem:[%s214_s0] sm:$0xff]  ;;  %s114_s24 = sshll.u32 %s172_s1, 4  ;;  %s115_s24 = int_to_ptr.vmem [resolvable:$true] %s114_s24 }
   0x5   :  { %134 = vmatprep.subr.mxu0 %v170_v1  ;;  %v122_v6 = vld [vmem:[%s216_s2] ss:$0 sm:$0xff]  ;;  %s148_s0 = scalar_lea.vmem %s115_s24, 128  ;;  %p153_p1 = scmp.lt.s32.totalorder %s115_s24, %s115_s24 }
   0x6   :  { %135 = vmatpush3.msra.mxu0 %v17_v3  ;;  %p149_p0 = scmp.ne.s32.totalorder %s115_s24, %s148_s0  ;;  %p154_p2 = scmp.lt.s32.totalorder %s148_s0, %s148_s0 }
   0x7   :  { %136 = vmatprep.subr.mxu0 %v170_v1 }
   0x8   :  { %137 = vmatpush3.msra.mxu0 %v16_v4  ;;  %p155_p3 = por %p154_p2, %p153_p1 }
   0x9   :  { %139 = vmatmul.mubr.msk.f32.vlgmr.msra.gmra.mxu0 %vm27_vm1, %v15_v5 }
   0xa   :  { %p156_p4 = pnand %p155_p3, %p149_p0 }
  0xc9   :  { %v97_v7 = vpop.f32.mrf.mxu0 }
  0xca   :  { %v98_v8 = vadd.f32 %v122_v6, %v97_v7 }
  0xcb   :  { %v140_v9 = vpop.f32.mrf.mxu0 }
  0xcc   :  { %v124_v10 = vmul.f32 -1.442695, %v98_v8 }
  0xce   :  { %144 = vpow2.f32 %v124_v10 }
  0xdb   :  { %v145_v11 = vpop.eup %144 }
  0xdc   :  { %v104_v12 = vadd.f32 1.0, %v145_v11 }
  0xde   :  { %146 = vrcp.f32 %v104_v12 }
  0xeb   :  { %v147_v13 = vpop.eup %146 }
  0xec   :  { %107 = vst [vmem:[#allocation2] sm:$0xff] %v147_v13 }
  0xed   :  { %159 = shalt.err (!%p156_p4)
}
  0xee   :  { %117 = dma.vmem_to_hbm [thread:$0]  %s115_s24, 128, %s217_s3, [#allocation3]  }
  0xef   :  { %168 = dma.done.wait [#allocation3], 128  }
  0xf0   :  { %169 = vsyncadd [#allocation3], 4294967168 }
  0xf1   :  { %121 = vsyncpa [#allocation3], 1 }

</bundles_post_ra>
